<compile_context>
chip_gen: v7x
topology: tpu7x:2x2x1
jax: 0.10.0
libtpu: 0.0.40
codegen_flags: <defaults>
</compile_context>

<pallas_src>
import functools

import jax
import jax.numpy as jnp
from jax import lax
from jax.experimental import pallas as pl
from jax.experimental.pallas import tpu as pltpu


# ----------------------------- kernels ------------------------------------


def _revin_norm_kernel(x_ref, w_ref, b_ref, y_ref, mean_ref, std_ref, *, eps):
    # x_ref: (Bb, T, C); w_ref/b_ref: (1, 1, C)
    x = x_ref[...].astype(jnp.float32)                       # (Bb, T, C)
    mean = jnp.mean(x, axis=1, keepdims=True)                # (Bb, 1, C)
    xc = x - mean                                            # reused for var & y
    # population variance (torch.var(..., unbiased=False))
    var = jnp.mean(xc * xc, axis=1, keepdims=True)           # (Bb, 1, C)
    std = jnp.sqrt(var + eps)                                # (Bb, 1, C) exact stdev out
    inv_std = lax.rsqrt(var + eps)                           # EUP, per-channel only

    scale = w_ref[...].astype(jnp.float32) * inv_std         # (Bb, 1, C)
    bias = b_ref[...].astype(jnp.float32)                    # (1, 1, C)
    y = xc * scale + bias                                    # mul+add per element

    y_ref[...] = y.astype(y_ref.dtype)
    mean_ref[...] = mean.astype(mean_ref.dtype)
    std_ref[...] = std.astype(std_ref.dtype)


def _revin_denorm_kernel(x_ref, mean_ref, std_ref, w_ref, b_ref, y_ref, *, eps):
    # x_ref: (Bb, Tt, C); mean/std: (Bb, 1, C); w/b: (1, 1, C)
    x = x_ref[...].astype(jnp.float32)
    w = w_ref[...].astype(jnp.float32)                       # (1, 1, C)
    b = b_ref[...].astype(jnp.float32)                       # (1, 1, C)
    mean = mean_ref[...].astype(jnp.float32)                 # (Bb, 1, C)
    std = std_ref[...].astype(jnp.float32)                   # (Bb, 1, C)

    # ((x - b) / (w + eps^2)) * std + mean  ==  x * scale + shift
    inv_w = 1.0 / (w + eps * eps)                            # per-channel only
    scale = std * inv_w                                      # (Bb, 1, C)
    shift = mean - b * scale                                 # (Bb, 1, C)
    y = x * scale + shift                                    # mul+add per element
    y_ref[...] = y.astype(y_ref.dtype)


# ----------------------------- tiling helpers -------------------------------

_TARGET_BLOCK_BYTES = 2 * 1024 * 1024  # ~2 MiB per x block


def _pick_block_b(B, T, C, itemsize, target_bytes=_TARGET_BLOCK_BYTES):
    """Largest batch-rows-per-block <= target that (preferably) divides B."""
    per_row = max(1, T * C * itemsize)
    bb = min(B, max(1, target_bytes // per_row))
    while bb > 1 and B % bb != 0:
        bb -= 1
    return bb


def _pick_tiles(B, T, C, itemsize, target_bytes=_TARGET_BLOCK_BYTES):
    """(Bb, Tt) for elementwise kernels; Tt is T or a multiple of 8."""
    row = max(1, C * itemsize)
    if T * row <= target_bytes or T < 8:
        return _pick_block_b(B, T, C, itemsize, target_bytes), T
    tt = max(8, (target_bytes // row) // 8 * 8)
    tt = min(tt, (T // 8) * 8)
    return 1, tt


def _vmem_limit(block_bytes):
    # in + out double-buffered (+ fp32 intermediates + headroom)
    need = 6 * block_bytes + (8 << 20)
    return int(min(max(32 << 20, need), 100 << 20))


# ----------------------------- wrappers ------------------------------------


def revin_norm(x, weight, bias, *, eps=1e-5):
    """x: (B, T, C) -> (y (B,T,C), mean (B,1,C), stdev (B,1,C))."""
    B, T, C = x.shape
    w3 = weight.reshape(1, 1, C)
    b3 = bias.reshape(1, 1, C)

    itemsize = jnp.dtype(x.dtype).itemsize
    bb = _pick_block_b(B, T, C, itemsize)
    block_bytes = bb * T * C * 4  # fp32 intermediates dominate
    grid_b = pl.cdiv(B, bb)

    kernel = functools.partial(_revin_norm_kernel, eps=eps)
    y, mean, std = pl.pallas_call(
        kernel,
        out_shape=(
            jax.ShapeDtypeStruct((B, T, C), x.dtype),
            jax.ShapeDtypeStruct((B, 1, C), jnp.float32),
            jax.ShapeDtypeStruct((B, 1, C), jnp.float32),
        ),
        grid_spec=pltpu.PrefetchScalarGridSpec(
            num_scalar_prefetch=0,
            grid=(grid_b,),
            in_specs=[
                pl.BlockSpec((bb, T, C), lambda i: (i, 0, 0)),
                pl.BlockSpec((1, 1, C), lambda i: (0, 0, 0)),
                pl.BlockSpec((1, 1, C), lambda i: (0, 0, 0)),
            ],
            out_specs=[
                pl.BlockSpec((bb, T, C), lambda i: (i, 0, 0)),
                pl.BlockSpec((bb, 1, C), lambda i: (i, 0, 0)),
                pl.BlockSpec((bb, 1, C), lambda i: (i, 0, 0)),
            ],
        ),
        compiler_params=pltpu.CompilerParams(
            dimension_semantics=("parallel",),
            vmem_limit_bytes=_vmem_limit(block_bytes),
        ),
    )(x, w3, b3)
    return y, mean, std


def revin_denorm(x, mean, stdev, weight, bias, *, eps=1e-5):
    """x: (B, T, C), mean/stdev: (B,1,C) -> y: (B,T,C)."""
    B, T, C = x.shape
    w3 = weight.reshape(1, 1, C)
    b3 = bias.reshape(1, 1, C)

    itemsize = jnp.dtype(x.dtype).itemsize
    bb, tt = _pick_tiles(B, T, C, itemsize)
    block_bytes = bb * tt * C * 4
    grid = (pl.cdiv(B, bb), pl.cdiv(T, tt))

    kernel = functools.partial(_revin_denorm_kernel, eps=eps)
    y = pl.pallas_call(
        kernel,
        out_shape=jax.ShapeDtypeStruct((B, T, C), x.dtype),
        grid_spec=pltpu.PrefetchScalarGridSpec(
            num_scalar_prefetch=0,
            grid=grid,
            in_specs=[
                pl.BlockSpec((bb, tt, C), lambda i, j: (i, j, 0)),
                pl.BlockSpec((bb, 1, C), lambda i, j: (i, 0, 0)),
                pl.BlockSpec((bb, 1, C), lambda i, j: (i, 0, 0)),
                pl.BlockSpec((1, 1, C), lambda i, j: (0, 0, 0)),
                pl.BlockSpec((1, 1, C), lambda i, j: (0, 0, 0)),
            ],
            out_specs=pl.BlockSpec((bb, tt, C), lambda i, j: (i, j, 0)),
        ),
        compiler_params=pltpu.CompilerParams(
            dimension_semantics=("parallel", "parallel"),
            vmem_limit_bytes=_vmem_limit(block_bytes),
        ),
    )(x, mean, stdev, w3, b3)
    return y


# ----------------------------- reference (pure JAX) -------------------------


def _ref_norm(x, weight, bias, eps):
    mean = jnp.mean(x, axis=1, keepdims=True)
    var = jnp.var(x, axis=1, keepdims=True)  # ddof=0 (unbiased=False)
    std = jnp.sqrt(var + eps)
    y = (x - mean) / std
    y = y * weight + bias
    return y, mean, std


def _ref_denorm(x, mean, std, weight, bias, eps):
    x = (x - bias) / (weight + eps * eps)
    return x * std + mean


# ----------------------------- main -----------------------------------------

if __name__ == "__main__":
    B, T, C = 2, 8, 32  # num_features = C = 32
    eps = 1e-5

    key = jax.random.PRNGKey(0)
    x = jax.random.normal(key, (B, T, C), dtype=jnp.float32) * 3.0 + 1.5

    # Deterministic parameter init (matches nn.Parameter(torch.ones/zeros)).
    affine_weight = jnp.ones((C,), dtype=jnp.float32)
    affine_bias = jnp.zeros((C,), dtype=jnp.float32)

    # mode == 'norm'
    y, mean, std = revin_norm(x, affine_weight, affine_bias, eps=eps)
    jax.block_until_ready((y, mean, std))

    # mode == 'denorm'
    x_rec = revin_denorm(y, mean, std, affine_weight, affine_bias, eps=eps)
    jax.block_until_ready(x_rec)

    # correctness vs pure-JAX reference of the PyTorch semantics
    y_ref, mean_ref, std_ref = _ref_norm(x, affine_weight, affine_bias, eps)
    x_rec_ref = _ref_denorm(y_ref, mean_ref, std_ref, affine_weight, affine_bias, eps)

    assert jnp.allclose(y, y_ref, atol=1e-5, rtol=1e-5)
    assert jnp.allclose(mean, mean_ref, atol=1e-5, rtol=1e-5)
    assert jnp.allclose(std, std_ref, atol=1e-5, rtol=1e-5)
    assert jnp.allclose(x_rec, x_rec_ref, atol=1e-5, rtol=1e-5)
    # round-trip should recover the original input (affine = identity here)
    assert jnp.allclose(x_rec, x, atol=1e-4, rtol=1e-4)

    print("KERNEL_OK")
</pallas_src>

<mosaic_0001>
module attributes {stable_mosaic.version = 11 : i64} {
  func.func @_revin_norm_kernel(%arg0: i32, %arg1: memref<2x8x32xf32, #tpu.memory_space<vmem>>, %arg2: memref<1x1x32xf32, #tpu.memory_space<vmem>>, %arg3: memref<1x1x32xf32, #tpu.memory_space<vmem>>, %arg4: memref<2x8x32xf32, #tpu.memory_space<vmem>>, %arg5: memref<2x1x32xf32, #tpu.memory_space<vmem>>, %arg6: memref<2x1x32xf32, #tpu.memory_space<vmem>>) attributes {dimension_semantics = [#tpu.dimension_semantics<parallel>], iteration_bounds = array<i64: 1>, scalar_prefetch = 0 : i64, scratch_operands = 0 : i64, tpu.core_type = #tpu.core_type<tc>, window_params = [{transform_indices = @transform_0, window_bounds = array<i64: 2, 8, 32>}, {pipeline_mode = #tpu.pipeline_mode<synchronous>, transform_indices = @transform_1, window_bounds = array<i64: 1, 1, 32>}, {pipeline_mode = #tpu.pipeline_mode<synchronous>, transform_indices = @transform_2, window_bounds = array<i64: 1, 1, 32>}, {transform_indices = @transform_3, window_bounds = array<i64: 2, 8, 32>}, {transform_indices = @transform_4, window_bounds = array<i64: 2, 1, 32>}, {transform_indices = @transform_5, window_bounds = array<i64: 2, 1, 32>}]} {
    %c0 = arith.constant 0 : index
    %c0_0 = arith.constant 0 : index
    %c0_1 = arith.constant 0 : index
    %0 = vector.load %arg1[%c0, %c0_0, %c0_1] : memref<2x8x32xf32, #tpu.memory_space<vmem>>, vector<2x8x32xf32>
    %cst = arith.constant dense<0.000000e+00> : vector<2x32xf32>
    %1 = vector.multi_reduction <add>, %0, %cst [1] : vector<2x8x32xf32> to vector<2x32xf32>
    %2 = vector.shape_cast %1 : vector<2x32xf32> to vector<2x1x32xf32>
    %cst_2 = arith.constant 8.000000e+00 : f32
    %3 = vector.broadcast %cst_2 : f32 to vector<2x1x32xf32>
    %4 = arith.divf %2, %3 : vector<2x1x32xf32>
    %5 = vector.broadcast %4 : vector<2x1x32xf32> to vector<2x8x32xf32>
    %6 = arith.subf %0, %5 : vector<2x8x32xf32>
    %7 = arith.mulf %6, %6 : vector<2x8x32xf32>
    %cst_3 = arith.constant dense<0.000000e+00> : vector<2x32xf32>
    %8 = vector.multi_reduction <add>, %7, %cst_3 [1] : vector<2x8x32xf32> to vector<2x32xf32>
    %9 = vector.shape_cast %8 : vector<2x32xf32> to vector<2x1x32xf32>
    %cst_4 = arith.constant 8.000000e+00 : f32
    %10 = vector.broadcast %cst_4 : f32 to vector<2x1x32xf32>
    %11 = arith.divf %9, %10 : vector<2x1x32xf32>
    %cst_5 = arith.constant 9.99999974E-6 : f32
    %12 = vector.broadcast %cst_5 : f32 to vector<2x1x32xf32>
    %13 = arith.addf %11, %12 : vector<2x1x32xf32>
    %14 = math.sqrt %13 : vector<2x1x32xf32>
    %cst_6 = arith.constant 9.99999974E-6 : f32
    %15 = vector.broadcast %cst_6 : f32 to vector<2x1x32xf32>
    %16 = arith.addf %11, %15 : vector<2x1x32xf32>
    %17 = math.rsqrt %16 : vector<2x1x32xf32>
    %c0_7 = arith.constant 0 : index
    %c0_8 = arith.constant 0 : index
    %c0_9 = arith.constant 0 : index
    %18 = vector.load %arg2[%c0_7, %c0_8, %c0_9] : memref<1x1x32xf32, #tpu.memory_space<vmem>>, vector<1x1x32xf32>
    %19 = vector.broadcast %18 : vector<1x1x32xf32> to vector<2x1x32xf32>
    %20 = arith.mulf %19, %17 : vector<2x1x32xf32>
    %c0_10 = arith.constant 0 : index
    %c0_11 = arith.constant 0 : index
    %c0_12 = arith.constant 0 : index
    %21 = vector.load %arg3[%c0_10, %c0_11, %c0_12] : memref<1x1x32xf32, #tpu.memory_space<vmem>>, vector<1x1x32xf32>
    %22 = vector.broadcast %20 : vector<2x1x32xf32> to vector<2x8x32xf32>
    %23 = arith.mulf %6, %22 : vector<2x8x32xf32>
    %24 = vector.broadcast %21 : vector<1x1x32xf32> to vector<2x8x32xf32>
    %25 = arith.addf %23, %24 : vector<2x8x32xf32>
    %c0_13 = arith.constant 0 : index
    %c0_14 = arith.constant 0 : index
    %c0_15 = arith.constant 0 : index
    %26 = vector.load %arg4[%c0_13, %c0_14, %c0_15] : memref<2x8x32xf32, #tpu.memory_space<vmem>>, vector<2x8x32xf32>
    tpu.vector_store %arg4[%c0_13, %c0_14, %c0_15], %25 {strides = array<i32>} : memref<2x8x32xf32, #tpu.memory_space<vmem>>, vector<2x8x32xf32>,
    %c0_16 = arith.constant 0 : index
    %c0_17 = arith.constant 0 : index
    %c0_18 = arith.constant 0 : index
    %27 = vector.load %arg5[%c0_16, %c0_17, %c0_18] : memref<2x1x32xf32, #tpu.memory_space<vmem>>, vector<2x1x32xf32>
    tpu.vector_store %arg5[%c0_16, %c0_17, %c0_18], %4 {strides = array<i32>} : memref<2x1x32xf32, #tpu.memory_space<vmem>>, vector<2x1x32xf32>,
    %c0_19 = arith.constant 0 : index
    %c0_20 = arith.constant 0 : index
    %c0_21 = arith.constant 0 : index
    %28 = vector.load %arg6[%c0_19, %c0_20, %c0_21] : memref<2x1x32xf32, #tpu.memory_space<vmem>>, vector<2x1x32xf32>
    tpu.vector_store %arg6[%c0_19, %c0_20, %c0_21], %14 {strides = array<i32>} : memref<2x1x32xf32, #tpu.memory_space<vmem>>, vector<2x1x32xf32>,
    return
  }
  func.func @transform_0(%arg0: i32) -> (i32, i32, i32) {
    %c0_i32 = arith.constant 0 : i32
    %c0_i32_0 = arith.constant 0 : i32
    %c0_i32_1 = arith.constant 0 : i32
    return %arg0, %c0_i32, %c0_i32_0 : i32, i32, i32
  }
  func.func @transform_1(%arg0: i32) -> (i32, i32, i32) {
    %c0_i32 = arith.constant 0 : i32
    %c0_i32_0 = arith.constant 0 : i32
    %c0_i32_1 = arith.constant 0 : i32
    %c0_i32_2 = arith.constant 0 : i32
    return %c0_i32, %c0_i32_0, %c0_i32_1 : i32, i32, i32
  }
  func.func @transform_2(%arg0: i32) -> (i32, i32, i32) {
    %c0_i32 = arith.constant 0 : i32
    %c0_i32_0 = arith.constant 0 : i32
    %c0_i32_1 = arith.constant 0 : i32
    %c0_i32_2 = arith.constant 0 : i32
    return %c0_i32, %c0_i32_0, %c0_i32_1 : i32, i32, i32
  }
  func.func @transform_3(%arg0: i32) -> (i32, i32, i32) {
    %c0_i32 = arith.constant 0 : i32
    %c0_i32_0 = arith.constant 0 : i32
    %c0_i32_1 = arith.constant 0 : i32
    return %arg0, %c0_i32, %c0_i32_0 : i32, i32, i32
  }
  func.func @transform_4(%arg0: i32) -> (i32, i32, i32) {
    %c0_i32 = arith.constant 0 : i32
    %c0_i32_0 = arith.constant 0 : i32
    %c0_i32_1 = arith.constant 0 : i32
    return %arg0, %c0_i32, %c0_i32_0 : i32, i32, i32
  }
  func.func @transform_5(%arg0: i32) -> (i32, i32, i32) {
    %c0_i32 = arith.constant 0 : i32
    %c0_i32_0 = arith.constant 0 : i32
    %c0_i32_1 = arith.constant 0 : i32
    return %arg0, %c0_i32, %c0_i32_0 : i32, i32, i32
  }
}

</mosaic_0001>

<bundles_post_ra>
// kernel: tpu_custom_call.1
= control target key start
LH: loop header
LB: loop body
LE: loop exit
PB: predicated region body
PF: predicated region fallthrough
CT: control target
= control target key end

     0   :  { %11 = vsyncpa [#allocation3], 0  ;;  %s404_s0 = inlined_call_operand.hbm [shape: f32[2,8,32], index: 0, kind: input, shape index: {}]   ;;  %s405_s1 = inlined_call_operand.vmem [shape: f32[1,1,32], index: 1, kind: input, shape index: {}]   ;;  %s406_s2 = inlined_call_operand.vmem [shape: f32[1,1,32], index: 2, kind: input, shape index: {}]   ;;  %s407_s3 = inlined_call_operand.hbm [shape: f32[2,8,32], index: 3, kind: output, shape index: {0}]   ;;  %s408_s4 = inlined_call_operand.hbm [shape: f32[2,1,32], index: 4, kind: output, shape index: {1}]   ;;  %s409_s5 = inlined_call_operand.hbm [shape: f32[2,1,32], index: 5, kind: output, shape index: {2}]  }
   0x1   :  { %12 = vsyncpa [#allocation4], 0 }
   0x2   :  { %13 = vsyncpa [#allocation7], 0  ;;  %s279_s18 = smov [#allocation2]   ;;  %s185_s22 = scalar_lea.hbm %s404_s0, 256 }
   0x3   :  { %s19_s19 = sshll.u32 %s279_s18, 4  ;;  %p186_p0 = scmp.ne.s32.totalorder %s404_s0, %s185_s22  ;;  %s20_s19 = int_to_ptr.vmem [resolvable:$true] %s19_s19 }
   0x4   :  { %p189_p1 = scmp.lt.u32.totalorder %s185_s22, %s404_s0 }
   0x6   :  { %p191_p2 = pnand %p189_p1, %p186_p0 }
   0x8   :  { %194 = shalt.err (!%p191_p2)
}
   0x9   :  { %s195_s27 = scalar_lea.vmem %s20_s19, 256  ;;  %p200_p4 = scmp.lt.s32.totalorder %s20_s19, %s20_s19 }
   0xa   :  { %p196_p3 = scmp.ne.s32.totalorder %s20_s19, %s195_s27  ;;  %p201_p5 = scmp.lt.s32.totalorder %s195_s27, %s195_s27 }
   0xc   :  { %p202_p6 = por %p201_p5, %p200_p4 }
   0xe   :  { %p203_p7 = pnand %p202_p6, %p196_p3 }
  0x10   :  { %206 = shalt.err (!%p203_p7)
}
  0x11   :  { %s280_s28 = smov 128   ;;  %s281_s29 = smov 8  }
  0x12   :  { %25 = dma.hbm_to_vmem [thread:$0]  %s404_s0, 256, %s20_s19, [#allocation3], %s280_s28, %s280_s28, %s281_s29  }
  0x13   :  { %273 = dma.done.wait [#allocation3], 256  }
  0x14   :  { %274 = vsyncadd [#allocation3], 4294967040  ;;  %vm35_vm0 = vcmask 261120   ;;  %v33_v0 = vld [vmem:[#allocation2] sm:$0xff]  ;;  %v34_v1 = vld [vmem:[#allocation2 + $0x8] sm:$0xff]  ;;  %s282_s0 = smov [#allocation6]  }
  0x15   :  { %v36_v2 = vsel %vm35_vm0, %v33_v0, 0.0  ;;  %v43_v3 = vsel %vm35_vm0, %v34_v1, 0.0  ;;  %s141_s7 = sshll.u32 %s282_s0, 4  ;;  %vm119_vm1 = vcmask 253952   ;;  %s142_s7 = int_to_ptr.vmem [resolvable:$true] %s141_s7 }
  0x16   :  { %v37_v4 = vrot.slane %v36_v2, 4  ;;  %v44_v5 = vrot.slane %v43_v3, 4  ;;  %s207_s8 = scalar_lea.vmem %s142_s7, 32  ;;  %p212_p9 = scmp.lt.s32.totalorder %s142_s7, %s142_s7 }
  0x17   :  { %p208_p8 = scmp.ne.s32.totalorder %s142_s7, %s207_s8  ;;  %p213_p10 = scmp.lt.s32.totalorder %s207_s8, %s207_s8 }
  0x18   :  { %v38_v6 = vadd.f32 %v37_v4, %v36_v2  ;;  %v45_v7 = vadd.f32 %v44_v5, %v43_v3 }
  0x19   :  { %p214_p11 = por %p213_p10, %p212_p9 }
  0x1a   :  { %v39_v8 = vrot.slane %v38_v6, 2  ;;  %v46_v9 = vrot.slane %v45_v7, 2 }
  0x1b   :  { %p215_p12 = pnand %p214_p11, %p208_p8 }
  0x1c   :  { %v40_v10 = vadd.f32 %v39_v8, %v38_v6  ;;  %v47_v11 = vadd.f32 %v46_v9, %v45_v7 }
  0x1e   :  { %v41_v12 = vrot.slane %v40_v10, 1  ;;  %v48_v13 = vrot.slane %v47_v11, 1 }
  0x20   :  { %v42_v14 = vadd.f32 %v41_v12, %v40_v10  ;;  %v49_v15 = vadd.f32 %v48_v13, %v47_v11 }
  0x22   :  { %v51_v16 = vmul.f32 0.125, %v42_v14  ;;  %v52_v17 = vmul.f32 0.125, %v49_v15 }
  0x24   :  { %v334_v18 = vsub.f32 %v33_v0, %v51_v16  ;;  %120 = vst.msk [vmem:[#allocation6] sm:$0x1] %vm119_vm1, %v51_v16  ;;  %v337_v19 = vsub.f32 %v34_v1, %v52_v17  ;;  %121 = vst.msk [vmem:[#allocation6 + $0x1] sm:$0x1] %vm119_vm1, %v52_v17 }
  0x25   :  { %218 = shalt.err (!%p215_p12)
}
  0x26   :  { %s219_s11 = scalar_lea.hbm %s408_s4, 32 }
  0x27   :  { %p220_p13 = scmp.ne.s32.totalorder %s408_s4, %s219_s11  ;;  %p223_p0 = scmp.lt.u32.totalorder %s219_s11, %s408_s4 }
  0x29   :  { %p225_p1 = pnand %p223_p0, %p220_p13 }
  0x2b   :  { %228 = shalt.err (!%p225_p1)
}
  0x2c   :  { %s283_s16 = smov 16   ;;  %s284_s17 = smov 1   ;;  %v55_v20 = vmul.f32 %v334_v18, %v334_v18  ;;  %v56_v21 = vmul.f32 %v337_v19, %v337_v19  ;;  %v97_v40 = vlaneseq  ;;  %v91_v42 = vld [vmem:[%s405_s1] sm:$0x1] }
  0x2d   :  { %147 = dma.vmem_to_hbm [thread:$0]  %s142_s7, 32, %s408_s4, [#allocation7], %s283_s16, %s283_s16, %s284_s17  }
  0x2e   :  { %v57_v22 = vsel %vm35_vm0, %v55_v20, 0.0  ;;  %v64_v23 = vsel %vm35_vm0, %v56_v21, 0.0  ;;  %v98_v41 = vshrl.u32 %v97_v40, 7  ;;  %s285_s21 = smov [#allocation8]   ;;  %v172_v54 = vld [vmem:[%s406_s2] ss:$0 sm:$0xff] }
  0x2f   :  { %v58_v24 = vrot.slane %v57_v22, 4  ;;  %v65_v25 = vrot.slane %v64_v23, 4  ;;  %s153_s22 = sshll.u32 %s285_s21, 4  ;;  %s286_s1 = smov [#allocation5]   ;;  %s154_s22 = int_to_ptr.vmem [resolvable:$true] %s153_s22 }
  0x30   :  { %v99_v43 = vsub.s32 0, %v98_v41  ;;  %s129_s25 = sshll.u32 %s286_s1, 4  ;;  %s229_s26 = scalar_lea.vmem %s154_s22, 32  ;;  %s130_s25 = int_to_ptr.vmem [resolvable:$true] %s129_s25 }
  0x31   :  { %v59_v26 = vadd.f32 %v58_v24, %v57_v22  ;;  %v66_v27 = vadd.f32 %v65_v25, %v64_v23  ;;  %p230_p2 = scmp.ne.s32.totalorder %s154_s22, %s229_s26  ;;  %p234_p3 = scmp.lt.s32.totalorder %s154_s22, %s154_s22 }
  0x32   :  { %p235_p4 = scmp.lt.s32.totalorder %s229_s26, %s229_s26 }
  0x33   :  { %v60_v28 = vrot.slane %v59_v26, 2  ;;  %v67_v29 = vrot.slane %v66_v27, 2 }
  0x34   :  { %p236_p5 = por %p235_p4, %p234_p3 }
  0x35   :  { %v61_v30 = vadd.f32 %v60_v28, %v59_v26  ;;  %v68_v31 = vadd.f32 %v67_v29, %v66_v27 }
  0x36   :  { %p237_p6 = pnand %p236_p5, %p230_p2 }
  0x37   :  { %v62_v32 = vrot.slane %v61_v30, 1  ;;  %v69_v33 = vrot.slane %v68_v31, 1 }
  0x39   :  { %v63_v34 = vadd.f32 %v62_v32, %v61_v30  ;;  %v70_v35 = vadd.f32 %v69_v33, %v68_v31 }
  0x3b   :  { %v71_v36 = vmul.f32 0.125, %v63_v34  ;;  %v72_v37 = vmul.f32 0.125, %v70_v35 }
  0x3d   :  { %v73_v38 = vadd.f32 1e-05, %v71_v36  ;;  %v74_v39 = vadd.f32 1e-05, %v72_v37 }
  0x3f   :  { %181 = vrsqrt.f32 %v73_v38  ;;  %vm77_vm2 = vcmp.eq.f32.partialorder %v73_v38, inf  ;;  %vm79_vm3 = vcmp.eq.f32.partialorder %v73_v38, 0.0  ;;  %v80_v45 = vand.u32 2147483648, %v73_v38 }
  0x40   :  { %183 = vrsqrt.f32 %v74_v39  ;;  %vm84_vm4 = vcmp.eq.f32.partialorder %v74_v39, inf  ;;  %v87_v49 = vand.u32 2147483648, %v74_v39  ;;  %vm86_vm5 = vcmp.eq.f32.partialorder %v74_v39, 0.0 }
  0x49   :  { %v182_v44 = vpop.eup %181 }
  0x4a   :  { %v184_v46 = vpop.eup %183  ;;  %v92_v47 = vmul.f32 %v182_v44, %v91_v42  ;;  %v76_v48 = vmul.f32 %v182_v44, %v73_v38 }
  0x4b   :  { %v93_v50 = vmul.f32 %v184_v46, %v91_v42  ;;  %v83_v51 = vmul.f32 %v184_v46, %v74_v39 }
  0x4c   :  { %v100_v52 = vrot.slane %v92_v47, %v99_v43  ;;  %v78_v53 = vsel %vm77_vm2, %v73_v38, %v76_v48 }
  0x4d   :  { %v104_v55 = vrot.slane %v93_v50, %v99_v43  ;;  %v81_v56 = vsel %vm79_vm3, %v80_v45, %v78_v53  ;;  %v85_v57 = vsel %vm84_vm4, %v74_v39, %v83_v51 }
  0x4e   :  { %v107_v58 = vmul.f32 %v100_v52, %v334_v18  ;;  %122 = vst.msk [vmem:[#allocation8] sm:$0x1] %vm119_vm1, %v81_v56  ;;  %v88_v59 = vsel %vm86_vm5, %v87_v49, %v85_v57 }
  0x4f   :  { %v108_v60 = vmul.f32 %v104_v55, %v337_v19  ;;  %123 = vst.msk [vmem:[#allocation8 + $0x1] sm:$0x1] %vm119_vm1, %v88_v59 }
  0x50   :  { %v115_v61 = vadd.f32 %v172_v54, %v107_v58 }
  0x51   :  { %240 = shalt.err (!%p237_p6)
}
  0x52   :  { %s241_s30 = scalar_lea.hbm %s409_s5, 32 }
  0x53   :  { %p242_p7 = scmp.ne.s32.totalorder %s409_s5, %s241_s30  ;;  %p245_p8 = scmp.lt.u32.totalorder %s241_s30, %s409_s5 }
  0x55   :  { %p247_p9 = pnand %p245_p8, %p242_p7 }
  0x57   :  { %250 = shalt.err (!%p247_p9)
}
  0x58   :  { %159 = dma.vmem_to_hbm [thread:$0]  %s154_s22, 32, %s409_s5, [#allocation7], %s283_s16, %s283_s16, %s284_s17   ;;  %v116_v62 = vadd.f32 %v172_v54, %v108_v60  ;;  %117 = vst.msk [vmem:[#allocation5] sm:$0xff] %vm35_vm0, %v115_v61 }
  0x59   :  { %s251_s11 = scalar_lea.vmem %s130_s25, 256  ;;  %p256_p11 = scmp.lt.s32.totalorder %s130_s25, %s130_s25 }
  0x5a   :  { %118 = vst.msk [vmem:[#allocation5 + $0x8] sm:$0xff] %vm35_vm0, %v116_v62  ;;  %p252_p10 = scmp.ne.s32.totalorder %s130_s25, %s251_s11  ;;  %p257_p12 = scmp.lt.s32.totalorder %s251_s11, %s251_s11 }
  0x5c   :  { %p258_p13 = por %p257_p12, %p256_p11 }
  0x5e   :  { %p259_p0 = pnand %p258_p13, %p252_p10 }
  0x60   :  { %262 = shalt.err (!%p259_p0)
}
  0x61   :  { %s263_s14 = scalar_lea.hbm %s407_s3, 256 }
  0x62   :  { %p264_p1 = scmp.ne.s32.totalorder %s407_s3, %s263_s14  ;;  %p267_p2 = scmp.lt.u32.totalorder %s263_s14, %s407_s3 }
  0x64   :  { %p269_p3 = pnand %p267_p2, %p264_p1 }
  0x66   :  { %272 = shalt.err (!%p269_p3)
}
  0x67   :  { %135 = dma.vmem_to_hbm [thread:$0]  %s130_s25, 256, %s407_s3, [#allocation4], %s280_s28, %s280_s28, %s281_s29  }
  0x68   :  { %275 = dma.done.wait [#allocation4], 256  }
  0x69   :  { %276 = vsyncadd [#allocation4], 4294967040 }
  0x6a   :  { %277 = dma.done.wait [#allocation7], 64  }
  0x6b   :  { %278 = vsyncadd [#allocation7], 4294967232 }
  0x6c   :  { %169 = vsyncpa [#allocation3], 1 }
  0x6d   :  { %170 = vsyncpa [#allocation4], 1 }
  0x6e   :  { %171 = vsyncpa [#allocation7], 1 }

</bundles_post_ra>
